<compile_context>
chip_gen: v5e
topology: v5e:2x2
jax: 0.10.0
libtpu: 0.0.40
codegen_flags: <defaults>
</compile_context>

<pallas_src>
import numpy as np
import jax
import jax.numpy as jnp
from jax import lax
from jax.experimental import pallas as pl
from jax.experimental.pallas import tpu as pltpu


def _round_up(n, m):
    return ((n + m - 1) // m) * m


# ---------------------------------------------------------------------------
# Fused double-conv block kernel
#   y = relu(W1f @ Xstack + b1f) * mask          (conv1 + folded BN1 + ReLU)
#   z = act2(W2f @ stack9(y) + b2f)              (conv2 + folded BN2 + act)
#   [z = z * <z, z_text> / ||z||]                (optional channel attention)
# ---------------------------------------------------------------------------
def _make_block_kernel(Wp, N, Lpad, act2, with_attn):
    tap_offsets = [kh * Wp + kw for kh in range(3) for kw in range(3)]

    def kernel(*refs):
        if with_attn:
            x_ref, w1_ref, b1_ref, w2_ref, b2_ref, mask_ref, t_ref, o_ref = refs
        else:
            x_ref, w1_ref, b1_ref, w2_ref, b2_ref, mask_ref, o_ref = refs

        x = x_ref[0]                                         # (9*Cin, N)

        # ---- conv1 (+ folded BN1) + ReLU : single MXU matmul -------------
        y = jnp.dot(w1_ref[...], x, preferred_element_type=jnp.float32)
        y = jnp.maximum(y + b1_ref[...], 0.0)
        # zero the pad ring / tail so conv2 sees proper zero padding
        y = y * mask_ref[...]                                # (C1, N)

        # ---- conv2 (+ folded BN2 when present): taps stacked on K -------
        stk = jnp.concatenate([y[:, s:s + Lpad] for s in tap_offsets], axis=0)
        z = jnp.dot(w2_ref[...], stk, preferred_element_type=jnp.float32)
        z = z + b2_ref[...]                                  # (C2, Lpad)
        if act2 == "relu":
            z = jnp.maximum(z, 0.0)
        elif act2 == "tanh":
            z = jnp.tanh(z)

        # ---- optional channel attention: zz * <zz/||zz||, z_text> -------
        if with_attn:
            t = t_ref[0]                                     # (C2, 1)
            ssq = jnp.sum(z * z, axis=0, keepdims=True)      # (1, Lpad)
            attn = jnp.sum(z * t, axis=0, keepdims=True) * lax.rsqrt(ssq)
            z = z * attn

        o_ref[0] = z

    return kernel


def conv_block_pallas(x, w1, b1, w2, b2, act2="none", z_text=None):
    """Fused [conv3x3 -> ReLU -> conv3x3 -> act2 (-> attention)] block.

    BatchNorm must already be folded into (w1, b1) / (w2, b2).
    x: (B, Cin, H, W) float32.  Returns (B, C2, H, W) float32.
    """
    B, Cin, H, W = x.shape
    C1 = w1.shape[0]
    C2 = w2.shape[0]
    Hp, Wp = H + 2, W + 2

    Lpad = _round_up(H * Wp, 128)           # lane-dense output width
    N = _round_up(2 * Wp + 2 + Lpad, 128)   # width of conv1 stack / intermediate

    # --- wrapper glue: im2col of the 2x-padded input (tap-major stacking) ---
    xp = jnp.pad(x, ((0, 0), (0, 0), (2, 2), (2, 2)))
    taps = [xp[:, :, kh:kh + Hp, kw:kw + Wp].reshape(B, Cin, Hp * Wp)
            for kh in range(3) for kw in range(3)]
    xs = jnp.concatenate(taps, axis=1)                        # (B, 9*Cin, Hp*Wp)
    xs = jnp.pad(xs, ((0, 0), (0, 0), (0, N - Hp * Wp)))      # lane-pad to N

    # flatten weights so row ordering matches the tap-major stacks
    w1f = jnp.transpose(w1, (0, 2, 3, 1)).reshape(C1, 9 * Cin)
    w2f = jnp.transpose(w2, (0, 2, 3, 1)).reshape(C2, 9 * C1)
    b1c = b1.reshape(C1, 1)
    b2c = b2.reshape(C2, 1)

    # interior mask over the flat padded frame (0 on the pad ring / tail)
    p = np.arange(N)
    row, col = p // Wp, p % Wp
    mask_np = ((row >= 1) & (row <= H) & (col >= 1) & (col <= W))
    mask = jnp.asarray(mask_np.astype(np.float32)[None, :])   # (1, N)

    with_attn = z_text is not None
    kernel = _make_block_kernel(Wp, N, Lpad, act2, with_attn)

    in_specs = [
        pl.BlockSpec((1, 9 * Cin, N), lambda b: (b, 0, 0)),
        pl.BlockSpec((C1, 9 * Cin), lambda b: (0, 0)),
        pl.BlockSpec((C1, 1), lambda b: (0, 0)),
        pl.BlockSpec((C2, 9 * C1), lambda b: (0, 0)),
        pl.BlockSpec((C2, 1), lambda b: (0, 0)),
        pl.BlockSpec((1, N), lambda b: (0, 0)),
    ]
    inputs = [xs, w1f, b1c, w2f, b2c, mask]
    if with_attn:
        in_specs.append(pl.BlockSpec((1, C2, 1), lambda b: (b, 0, 0)))
        inputs.append(z_text.astype(jnp.float32).reshape(B, C2, 1))

    out = pl.pallas_call(
        kernel,
        out_shape=jax.ShapeDtypeStruct((B, C2, Lpad), jnp.float32),
        grid_spec=pltpu.PrefetchScalarGridSpec(
            num_scalar_prefetch=0,
            grid=(B,),
            in_specs=in_specs,
            out_specs=pl.BlockSpec((1, C2, Lpad), lambda b: (b, 0, 0)),
        ),
        compiler_params=pltpu.CompilerParams(
            dimension_semantics=("parallel",)),
    )(*inputs)

    # output lane q = i*Wp + j  ->  reshape and strip the pad columns
    return out[:, :, :H * Wp].reshape(B, C2, H, Wp)[:, :, :, :W]


# ---------------------------------------------------------------------------
# Plain-JAX glue: BN folding and PyTorch-style bilinear resize
# ---------------------------------------------------------------------------
def _fold_bn(w, b, bn, eps):
    gamma, beta, mean, var = bn
    scale = gamma / jnp.sqrt(var + eps)
    return w * scale[:, None, None, None], (b - mean) * scale + beta


def _bilinear_resize(x, out_h, out_w, align_corners):
    """PyTorch-style bilinear resize for NCHW tensors."""
    B, C, H, W = x.shape

    def src_index(out_n, in_n):
        d = jnp.arange(out_n, dtype=jnp.float32)
        if align_corners:
            if out_n == 1:
                s = jnp.zeros_like(d)
            else:
                s = d * (float(in_n - 1) / float(out_n - 1))
        else:
            s = (d + 0.5) * (float(in_n) / float(out_n)) - 0.5
            s = jnp.clip(s, 0.0, float(in_n - 1))
        i0 = jnp.clip(jnp.floor(s).astype(jnp.int32), 0, in_n - 1)
        i1 = jnp.minimum(i0 + 1, in_n - 1)
        f = s - i0.astype(jnp.float32)
        return i0, i1, f

    r0, r1, fr = src_index(out_h, H)
    c0, c1, fc = src_index(out_w, W)
    fr = fr[None, None, :, None]
    fc = fc[None, None, None, :]
    xr = x[:, :, r0, :] * (1.0 - fr) + x[:, :, r1, :] * fr
    return xr[:, :, :, c0] * (1.0 - fc) + xr[:, :, :, c1] * fc


# ---------------------------------------------------------------------------
# MMDecoder forward (Pallas-backed) and pure-JAX reference
# ---------------------------------------------------------------------------
def mmdecoder_forward(z, z_text, params, out_size, eps=1e-5):
    """Pallas MMDecoder forward (eval-mode BN; Dropout2d(p=0) == identity)."""
    p = params

    # BottleneckBlock (conv->BN->relu->conv->BN->relu) fused with the
    # channel attention  zz * sum_c(zz_norm * z_text).
    w1, b1 = _fold_bn(p["bneck_w1"], p["bneck_b1"], p["bneck_bn1"], eps)
    w2, b2 = _fold_bn(p["bneck_w2"], p["bneck_b2"], p["bneck_bn2"], eps)
    zz = conv_block_pallas(z, w1, b1, w2, b2, act2="relu", z_text=z_text)

    # up0 (func='relu'): Upsample(2x bilinear) -> conv->BN->relu -> conv->BN->relu
    zz = _bilinear_resize(zz, 2 * zz.shape[2], 2 * zz.shape[3], align_corners=False)
    w1, b1 = _fold_bn(p["up0_w1"], p["up0_b1"], p["up0_bn1"], eps)
    w2, b2 = _fold_bn(p["up0_w2"], p["up0_b2"], p["up0_bn2"], eps)
    zz = conv_block_pallas(zz, w1, b1, w2, b2, act2="relu")

    # up1 (func='None'): Upsample -> conv->BN->relu -> conv (no BN2 / no act)
    zz = _bilinear_resize(zz, 2 * zz.shape[2], 2 * zz.shape[3], align_corners=False)
    w1, b1 = _fold_bn(p["up1_w1"], p["up1_b1"], p["up1_bn1"], eps)
    zz = conv_block_pallas(zz, w1, b1, p["up1_w2"], p["up1_b2"], act2="none")

    # final F.interpolate(..., align_corners=True) + sigmoid
    zz = _bilinear_resize(zz, out_size[0], out_size[1], align_corners=True)
    return jax.nn.sigmoid(zz)


def mmdecoder_reference(z, z_text, params, out_size, eps=1e-5):
    """Pure-JAX reference matching the PyTorch forward (eval-mode BN)."""
    def conv(x, w, b):
        dn = lax.conv_dimension_numbers(x.shape, w.shape, ("NCHW", "OIHW", "NCHW"))
        y = lax.conv_general_dilated(x, w, (1, 1), "SAME", dimension_numbers=dn,
                                     precision=lax.Precision.HIGHEST)
        return y + b[None, :, None, None]

    def bn(x, bnp):
        gamma, beta, mean, var = bnp
        inv = 1.0 / jnp.sqrt(var + eps)
        return ((x - mean[None, :, None, None]) * (inv * gamma)[None, :, None, None]
                + beta[None, :, None, None])

    p = params
    # BottleneckBlock
    x = jnp.maximum(bn(conv(z, p["bneck_w1"], p["bneck_b1"]), p["bneck_bn1"]), 0.0)
    zz = jnp.maximum(bn(conv(x, p["bneck_w2"], p["bneck_b2"]), p["bneck_bn2"]), 0.0)
    # channel attention
    norm = jnp.sqrt(jnp.sum(zz * zz, axis=1, keepdims=True))
    attn = jnp.sum((zz / norm) * z_text[:, :, None, None], axis=1, keepdims=True)
    zz = zz * attn
    # up0 (func='relu')
    zz = _bilinear_resize(zz, 2 * zz.shape[2], 2 * zz.shape[3], align_corners=False)
    x = jnp.maximum(bn(conv(zz, p["up0_w1"], p["up0_b1"]), p["up0_bn1"]), 0.0)
    zz = jnp.maximum(bn(conv(x, p["up0_w2"], p["up0_b2"]), p["up0_bn2"]), 0.0)
    # up1 (func='None')
    zz = _bilinear_resize(zz, 2 * zz.shape[2], 2 * zz.shape[3], align_corners=False)
    x = jnp.maximum(bn(conv(zz, p["up1_w1"], p["up1_b1"]), p["up1_bn1"]), 0.0)
    zz = conv(x, p["up1_w2"], p["up1_b2"])
    # final resize + sigmoid
    zz = _bilinear_resize(zz, out_size[0], out_size[1], align_corners=True)
    return jax.nn.sigmoid(zz)


if __name__ == "__main__":
    B = 2
    full_features = (8, 8, 16, 16, 32)      # only indices [3], [4] are used
    z_size = 16
    out_channel = 8
    out_size = (36, 36)
    Hz = Wz = 8                             # spatial size of the latent z

    key = jax.random.PRNGKey(0)
    keys = iter(jax.random.split(key, 32))

    def conv_init(cin, cout):
        bound = 1.0 / np.sqrt(cin * 9)
        w = jax.random.uniform(next(keys), (cout, cin, 3, 3), jnp.float32, -bound, bound)
        b = jax.random.uniform(next(keys), (cout,), jnp.float32, -bound, bound)
        return w, b

    def bn_init(c):
        k1, k2, k3, k4 = jax.random.split(next(keys), 4)
        return (jax.random.uniform(k1, (c,), jnp.float32, 0.5, 1.5),   # gamma
                jax.random.uniform(k2, (c,), jnp.float32, 0.1, 0.6),   # beta
                0.1 * jax.random.normal(k3, (c,), jnp.float32),        # running mean
                jax.random.uniform(k4, (c,), jnp.float32, 0.5, 1.5))   # running var

    params = {}
    # BottleneckBlock(full_features[4] -> z_size)
    params["bneck_w1"], params["bneck_b1"] = conv_init(full_features[4], z_size)
    params["bneck_bn1"] = bn_init(z_size)
    params["bneck_w2"], params["bneck_b2"] = conv_init(z_size, z_size)
    params["bneck_bn2"] = bn_init(z_size)
    # UpBlock up0 (z_size -> full_features[3], func='relu')
    params["up0_w1"], params["up0_b1"] = conv_init(z_size, full_features[3])
    params["up0_bn1"] = bn_init(full_features[3])
    params["up0_w2"], params["up0_b2"] = conv_init(full_features[3], full_features[3])
    params["up0_bn2"] = bn_init(full_features[3])
    # UpBlock up1 (full_features[3] -> out_channel, func='None')
    params["up1_w1"], params["up1_b1"] = conv_init(full_features[3], out_channel)
    params["up1_bn1"] = bn_init(out_channel)
    params["up1_w2"], params["up1_b2"] = conv_init(out_channel, out_channel)
    # (up1.BN2 exists in the module but is unused when func='None'.)

    z = jax.random.normal(next(keys), (B, full_features[4], Hz, Wz), jnp.float32)
    z_text = jax.random.normal(next(keys), (B, z_size), jnp.float32)

    out = jax.block_until_ready(mmdecoder_forward(z, z_text, params, out_size))
    assert out.shape == (B, out_channel, out_size[0], out_size[1]), out.shape

    ref = jax.block_until_ready(mmdecoder_reference(z, z_text, params, out_size))
    np.testing.assert_allclose(np.asarray(out), np.asarray(ref),
                               rtol=1e-2, atol=1e-2)

    print("KERNEL_OK")
</pallas_src>

<mosaic_0001>
module attributes {stable_mosaic.version = 11 : i64} {
  func.func @kernel(%arg0: i32, %arg1: memref<1x288x256xf32, #tpu.memory_space<vmem>>, %arg2: memref<16x288xf32, #tpu.memory_space<vmem>>, %arg3: memref<16x1xf32, #tpu.memory_space<vmem>>, %arg4: memref<16x144xf32, #tpu.memory_space<vmem>>, %arg5: memref<16x1xf32, #tpu.memory_space<vmem>>, %arg6: memref<1x256xf32, #tpu.memory_space<vmem>>, %arg7: memref<1x16x1xf32, #tpu.memory_space<vmem>>, %arg8: memref<1x16x128xf32, #tpu.memory_space<vmem>>) attributes {dimension_semantics = [#tpu.dimension_semantics<parallel>], iteration_bounds = array<i64: 2>, scalar_prefetch = 0 : i64, scratch_operands = 0 : i64, tpu.core_type = #tpu.core_type<tc>, window_params = [{transform_indices = @transform_0, window_bounds = array<i64: 1, 288, 256>}, {pipeline_mode = #tpu.pipeline_mode<synchronous>, transform_indices = @transform_1, window_bounds = array<i64: 16, 288>}, {pipeline_mode = #tpu.pipeline_mode<synchronous>, transform_indices = @transform_2, window_bounds = array<i64: 16, 1>}, {pipeline_mode = #tpu.pipeline_mode<synchronous>, transform_indices = @transform_3, window_bounds = array<i64: 16, 144>}, {pipeline_mode = #tpu.pipeline_mode<synchronous>, transform_indices = @transform_4, window_bounds = array<i64: 16, 1>}, {pipeline_mode = #tpu.pipeline_mode<synchronous>, transform_indices = @transform_5, window_bounds = array<i64: 1, 256>}, {transform_indices = @transform_6, window_bounds = array<i64: 1, 16, 1>}, {transform_indices = @transform_7, window_bounds = array<i64: 1, 16, 128>}]} {
    %c0 = arith.constant 0 : index
    %c0_0 = arith.constant 0 : index
    %c0_1 = arith.constant 0 : index
    %0 = vector.load %arg1[%c0, %c0_0, %c0_1] : memref<1x288x256xf32, #tpu.memory_space<vmem>>, vector<1x288x256xf32>
    %1 = vector.shape_cast %0 : vector<1x288x256xf32> to vector<288x256xf32>
    %c0_2 = arith.constant 0 : index
    %c0_3 = arith.constant 0 : index
    %2 = vector.load %arg2[%c0_2, %c0_3] : memref<16x288xf32, #tpu.memory_space<vmem>>, vector<16x288xf32>
    %cst = arith.constant dense<0.000000e+00> : vector<16x256xf32>
    %3 = tpu.matmul %2, %1, %cst {dimension_numbers = #tpu.dot_dimension_numbers<[1], [0], [0], [1], [0, 0, 1, 1], [], []>} : vector<16x288xf32>, vector<288x256xf32>, vector<16x256xf32> -> vector<16x256xf32>
    %c0_4 = arith.constant 0 : index
    %c0_5 = arith.constant 0 : index
    %4 = vector.load %arg3[%c0_4, %c0_5] : memref<16x1xf32, #tpu.memory_space<vmem>>, vector<16x1xf32>
    %5 = vector.broadcast %4 : vector<16x1xf32> to vector<16x256xf32>
    %6 = arith.addf %3, %5 : vector<16x256xf32>
    %cst_6 = arith.constant 0.000000e+00 : f32
    %7 = vector.broadcast %cst_6 : f32 to vector<16x256xf32>
    %8 = arith.maximumf %6, %7 : vector<16x256xf32>
    %c0_7 = arith.constant 0 : index
    %c0_8 = arith.constant 0 : index
    %9 = vector.load %arg6[%c0_7, %c0_8] : memref<1x256xf32, #tpu.memory_space<vmem>>, vector<1x256xf32>
    %10 = vector.broadcast %9 : vector<1x256xf32> to vector<16x256xf32>
    %11 = arith.mulf %8, %10 : vector<16x256xf32>
    %12 = vector.extract_strided_slice %11 {offsets = [0, 0], sizes = [16, 128], strides = [1, 1]} : vector<16x256xf32> to vector<16x128xf32>
    %13 = vector.extract_strided_slice %11 {offsets = [0, 1], sizes = [16, 128], strides = [1, 1]} : vector<16x256xf32> to vector<16x128xf32>
    %14 = vector.extract_strided_slice %11 {offsets = [0, 2], sizes = [16, 128], strides = [1, 1]} : vector<16x256xf32> to vector<16x128xf32>
    %15 = vector.extract_strided_slice %11 {offsets = [0, 10], sizes = [16, 128], strides = [1, 1]} : vector<16x256xf32> to vector<16x128xf32>
    %16 = vector.extract_strided_slice %11 {offsets = [0, 11], sizes = [16, 128], strides = [1, 1]} : vector<16x256xf32> to vector<16x128xf32>
    %17 = vector.extract_strided_slice %11 {offsets = [0, 12], sizes = [16, 128], strides = [1, 1]} : vector<16x256xf32> to vector<16x128xf32>
    %18 = vector.extract_strided_slice %11 {offsets = [0, 20], sizes = [16, 128], strides = [1, 1]} : vector<16x256xf32> to vector<16x128xf32>
    %19 = vector.extract_strided_slice %11 {offsets = [0, 21], sizes = [16, 128], strides = [1, 1]} : vector<16x256xf32> to vector<16x128xf32>
    %20 = vector.extract_strided_slice %11 {offsets = [0, 22], sizes = [16, 128], strides = [1, 1]} : vector<16x256xf32> to vector<16x128xf32>
    %21 = tpu.concatenate %12, %13, %14, %15, %16, %17, %18, %19, %20 in 0 : vector<16x128xf32>, vector<16x128xf32>, vector<16x128xf32>, vector<16x128xf32>, vector<16x128xf32>, vector<16x128xf32>, vector<16x128xf32>, vector<16x128xf32>, vector<16x128xf32> -> vector<144x128xf32>
    %c0_9 = arith.constant 0 : index
    %c0_10 = arith.constant 0 : index
    %22 = vector.load %arg4[%c0_9, %c0_10] : memref<16x144xf32, #tpu.memory_space<vmem>>, vector<16x144xf32>
    %cst_11 = arith.constant dense<0.000000e+00> : vector<16x128xf32>
    %23 = tpu.matmul %22, %21, %cst_11 {dimension_numbers = #tpu.dot_dimension_numbers<[1], [0], [0], [1], [0, 0, 1, 1], [], []>} : vector<16x144xf32>, vector<144x128xf32>, vector<16x128xf32> -> vector<16x128xf32>
    %c0_12 = arith.constant 0 : index
    %c0_13 = arith.constant 0 : index
    %24 = vector.load %arg5[%c0_12, %c0_13] : memref<16x1xf32, #tpu.memory_space<vmem>>, vector<16x1xf32>
    %25 = vector.broadcast %24 : vector<16x1xf32> to vector<16x128xf32>
    %26 = arith.addf %23, %25 : vector<16x128xf32>
    %cst_14 = arith.constant 0.000000e+00 : f32
    %27 = vector.broadcast %cst_14 : f32 to vector<16x128xf32>
    %28 = arith.maximumf %26, %27 : vector<16x128xf32>
    %c0_15 = arith.constant 0 : index
    %c0_16 = arith.constant 0 : index
    %c0_17 = arith.constant 0 : index
    %29 = vector.load %arg7[%c0_15, %c0_16, %c0_17] : memref<1x16x1xf32, #tpu.memory_space<vmem>>, vector<1x16x1xf32>
    %30 = vector.shape_cast %29 : vector<1x16x1xf32> to vector<16x1xf32>
    %31 = arith.mulf %28, %28 : vector<16x128xf32>
    %cst_18 = arith.constant dense<0.000000e+00> : vector<128xf32>
    %32 = vector.multi_reduction <add>, %31, %cst_18 [0] : vector<16x128xf32> to vector<128xf32>
    %33 = vector.shape_cast %32 : vector<128xf32> to vector<1x128xf32>
    %34 = vector.broadcast %30 : vector<16x1xf32> to vector<16x128xf32>
    %35 = arith.mulf %28, %34 : vector<16x128xf32>
    %cst_19 = arith.constant dense<0.000000e+00> : vector<128xf32>
    %36 = vector.multi_reduction <add>, %35, %cst_19 [0] : vector<16x128xf32> to vector<128xf32>
    %37 = vector.shape_cast %36 : vector<128xf32> to vector<1x128xf32>
    %38 = math.rsqrt %33 : vector<1x128xf32>
    %39 = arith.mulf %37, %38 : vector<1x128xf32>
    %40 = vector.broadcast %39 : vector<1x128xf32> to vector<16x128xf32>
    %41 = arith.mulf %28, %40 : vector<16x128xf32>
    %c0_20 = arith.constant 0 : index
    %c0_21 = arith.constant 0 : index
    %c0_22 = arith.constant 0 : index
    %42 = vector.load %arg8[%c0_20, %c0_21, %c0_22] : memref<1x16x128xf32, #tpu.memory_space<vmem>>, vector<1x16x128xf32>
    %43 = vector.shape_cast %42 : vector<1x16x128xf32> to vector<16x128xf32>
    %44 = vector.shape_cast %41 : vector<16x128xf32> to vector<1x16x128xf32>
    tpu.vector_store %arg8[%c0_20, %c0_21, %c0_22], %44 {strides = array<i32>} : memref<1x16x128xf32, #tpu.memory_space<vmem>>, vector<1x16x128xf32>,
    return
  }
  func.func @transform_0(%arg0: i32) -> (i32, i32, i32) {
    %c0_i32 = arith.constant 0 : i32
    %c0_i32_0 = arith.constant 0 : i32
    %c0_i32_1 = arith.constant 0 : i32
    return %arg0, %c0_i32, %c0_i32_0 : i32, i32, i32
  }
  func.func @transform_1(%arg0: i32) -> (i32, i32) {
    %c0_i32 = arith.constant 0 : i32
    %c0_i32_0 = arith.constant 0 : i32
    %c0_i32_1 = arith.constant 0 : i32
    return %c0_i32, %c0_i32_0 : i32, i32
  }
  func.func @transform_2(%arg0: i32) -> (i32, i32) {
    %c0_i32 = arith.constant 0 : i32
    %c0_i32_0 = arith.constant 0 : i32
    %c0_i32_1 = arith.constant 0 : i32
    return %c0_i32, %c0_i32_0 : i32, i32
  }
  func.func @transform_3(%arg0: i32) -> (i32, i32) {
    %c0_i32 = arith.constant 0 : i32
    %c0_i32_0 = arith.constant 0 : i32
    %c0_i32_1 = arith.constant 0 : i32
    return %c0_i32, %c0_i32_0 : i32, i32
  }
  func.func @transform_4(%arg0: i32) -> (i32, i32) {
    %c0_i32 = arith.constant 0 : i32
    %c0_i32_0 = arith.constant 0 : i32
    %c0_i32_1 = arith.constant 0 : i32
    return %c0_i32, %c0_i32_0 : i32, i32
  }
  func.func @transform_5(%arg0: i32) -> (i32, i32) {
    %c0_i32 = arith.constant 0 : i32
    %c0_i32_0 = arith.constant 0 : i32
    %c0_i32_1 = arith.constant 0 : i32
    return %c0_i32, %c0_i32_0 : i32, i32
  }
  func.func @transform_6(%arg0: i32) -> (i32, i32, i32) {
    %c0_i32 = arith.constant 0 : i32
    %c0_i32_0 = arith.constant 0 : i32
    %c0_i32_1 = arith.constant 0 : i32
    return %arg0, %c0_i32, %c0_i32_0 : i32, i32, i32
  }
  func.func @transform_7(%arg0: i32) -> (i32, i32, i32) {
    %c0_i32 = arith.constant 0 : i32
    %c0_i32_0 = arith.constant 0 : i32
    %c0_i32_1 = arith.constant 0 : i32
    return %arg0, %c0_i32, %c0_i32_0 : i32, i32, i32
  }
}

</mosaic_0001>

<bundles_post_ra>
// kernel: tpu_custom_call.1
= control target key start
LH: loop header
LB: loop body
LE: loop exit
PB: predicated region body
PF: predicated region fallthrough
CT: control target
= control target key end

     0   :  { %s1576_s0 = inlined_call_operand.hbm [shape: f32[2,288,256], index: 0, kind: input, shape index: {}]   ;;  %s1577_s1 = inlined_call_operand.vmem [shape: f32[16,288], index: 1, kind: input, shape index: {}]   ;;  %s1578_s2 = inlined_call_operand.vmem [shape: f32[16,1], index: 2, kind: input, shape index: {}]   ;;  %s1579_s3 = inlined_call_operand.hbm [shape: f32[16,144], index: 3, kind: input, shape index: {}]   ;;  %s1580_s4 = inlined_call_operand.vmem [shape: f32[16,1], index: 4, kind: input, shape index: {}]   ;;  %s1581_s5 = inlined_call_operand.vmem [shape: f32[1,256], index: 5, kind: input, shape index: {}]   ;;  %s1582_s6 = inlined_call_operand.vmem [shape: f32[2,16,1], index: 6, kind: input, shape index: {}]   ;;  %s1583_s7 = inlined_call_operand.hbm [shape: f32[2,16,128], index: 7, kind: output, shape index: {}]  }
   0x1   :  { %1587 = sst [smem:[#allocation13_spill]] %s1579_s3 }
   0x2   :  { %12 = vsyncpa [#allocation3], 0 }
   0x3   :  { %14 = vsyncpa [#allocation3 + $0x1], 0 }
   0x4   :  { %15 = vsyncpa [#allocation6], 0 }
   0x5   :  { %16 = vsyncpa [#allocation4], 0 }
   0x6   :  { %18 = vsyncpa [#allocation4 + $0x1], 0  ;;  %s1287_s24 = smov 0   ;;  %s1289_s25 = smov 0  }
   0x7   :  { %s1291_s26 = smov 0   ;;  %s1293_s27 = smov 0  }
   0x8 LB: > { %1588 = sst [smem:[#allocation11_spill]] %s1227_s26  ;;  %s1308_s28 = sadd.s32 4294967295, %s1231_s27   ;;  %s1231_s27 = sphi %s1293_s27, %s1603_s27   ;;  %s1227_s26 = sphi %s1291_s26, %s1600_s26   ;;  %s1223_s25 = sphi %s1289_s25, %s1602_s25   ;;  %s1219_s24 = sphi %s1287_s24, %s1601_s24  }
   0x9   : > { %s920_s29 = sadd.s32 4294967294, %s1231_s27   ;;  %p44_p0 = scmp.ne.s32.totalorder %s1223_s25, %s1219_s24 }
   0xa   : > { %p45_p1 = scmp.eq.s32.totalorder %s1308_s28, 0  ;;  %p199_p2 = scmp.eq.s32.totalorder %s1308_s28, 1 }
   0xb   : > { %p205_p3 = scmp.eq.s32.totalorder %s920_s29, 1  ;;  %p921_p5 = scmp.ge.s32.totalorder %s1231_s27, 1 }
   0xc   : > { %p1317_p4 = por %p45_p1, %p44_p0  ;;  %p212_p7 = scmp.lt.s32.totalorder %s1231_s27, 3 }
   0xd   : > { %p1322_p6 = por %p205_p3, %p44_p0  ;;  %s1591_s3 = sld [smem:[#allocation13_spill]] }
   0xe   : > { %p1330_p8 = pnand %p921_p5, %p212_p7  ;;  %s1233_s13 = smov [#allocation5]  }
   0xf   : > { %s231_s14 = sshll.u32 %s1233_s13, 4  ;;  %s1340_s15 = sadd.s32 1, %s1231_s27   ;;  %s232_s14 = int_to_ptr.vmem [resolvable:$true] %s231_s14 }
  0x10   : > { %p954_p9 = pneg %p1330_p8  ;;  %s1584_s16 = smov 256  }
  0x11   : > { %s1585_s17 = smov 16   ;;  %s28_s18 = ssub.s32 %s1231_s27, %s1340_s15 }
  0x12   : > { %p955_p10 = pnand %p954_p9, %p45_p1  ;;  %s31_s19 = sadd.s32 1, %s1227_s26 }
  0x13   : > { %s229_s11 = sshll.u32 %s1591_s3, 4  ;;  %p29_p12 = scmp.eq.s32.totalorder %s28_s18, 0  ;;  %s230_s11 = int_to_ptr.hbm [resolvable:$true] %s229_s11 }
  0x14   : > { %957 = dma.hbm_to_vmem [thread:$0]  (!%p955_p10), %s230_s11, 512, %s232_s14, [#allocation6], %s1584_s16, %s1584_s16, %s1585_s17  }
  0x15   : > { %p38_p13 = scmp.ne.s32.totalorder %s1227_s26, %s1223_s25  ;;  %p39_p0 = scmp.eq.s32.totalorder %s1231_s27, 0 }
  0x16   : > { %p967_p3 = scmp.lt.s32.totalorder %s1231_s27, 2  ;;  %s251_s22 = sand.u32 1, %s1227_s26  }
  0x17   : > { %s1353_s20 = scalar_select %p29_p12, %s1227_s26, %s31_s19  }
  0x18   : > { %p40_p5 = por %p39_p0, %p38_p13  ;;  %p1357_p7 = por %p199_p2, %p38_p13 }
  0x19   : > { %1593 = sst [smem:[#allocation12_spill]] %s1353_s20  ;;  %s944_s23 = smul.u32 576, %s1231_s27 }
  0x1a   : > { %s943_s29 = smul.u32 576, %s251_s22  ;;  %p1366_p9 = pnand %p967_p3, %p40_p5 }
  0x1b   : > { %s260_s11 = scalar_lea.hbm %s1576_s0, %s944_s23  ;;  %s252_s16 = scalar_lea.sflag [#allocation3], %s251_s22 }
  0x1c   : > { %s261_s14 = sshll.u32 %s260_s11, 4  ;;  %s255_s18 = scalar_lea.vmem [#allocation2], %s943_s29  ;;  %s262_s14 = int_to_ptr.hbm [resolvable:$true] %s261_s14 }
  0x1d   : > { %s263_s19 = sshll.u32 %s255_s18, 4  ;;  %s1131_s17 = sshra.s32 %s262_s14, 4  ;;  %s264_s19 = int_to_ptr.vmem [resolvable:$true] %s263_s19  ;;  %s1132_s17 = int_to_ptr.hbm [resolvable:$true] %s1131_s17 }
  0x1e   : > { %s1133_s3 = scalar_lea.hbm %s1132_s17, 576  ;;  %p1135_p10 = pneg %p1366_p9 }
  0x1f   : > { %p1134_p2 = scmp.ne.s32.totalorder %s1132_s17, %s1133_s3  ;;  %s1138_s10 = scalar_lea.hbm %s1576_s0, 1152 }
  0x20   : > { %p1139_p0 = scmp.lt.s32.totalorder %s1132_s17, %s1576_s0  ;;  %p1140_p3 = scmp.lt.s32.totalorder %s1138_s10, %s1133_s3 }
  0x21   : > { %p1136_p12 = pnand %p1135_p10, %p1134_p2 }
  0x22   : > { %p1141_p5 = por %p1140_p3, %p1139_p0 }
  0x23   : > { %p1137_p13 = pneg %p1136_p12 }
  0x25   : > { %p1142_p11 = pnand %p1141_p5, %p1137_p13 }
  0x27   : > { %1145 = shalt.err (!%p1142_p11)
}
  0x28   : > { %s1596_s22 = smov 16   ;;  %s1597_s29 = smov 256  }
  0x29   : > { %961 = dma.hbm_to_vmem [thread:$0]  (!%p1366_p9), %s262_s14, 9216, %s264_s19, %s252_s16, %s1597_s29, %s1597_s29, %s1596_s22  }
  0x2a   : > { %283 = sbr.rel (%p1330_p8) target bundleno = 581 (0x245), region = 48  ;;  %s1386_s11 = sand.u32 (!%p1330_p8), 1, %s1223_s25  }
  0x2b   : > { %s945_s26 = smul.u32 (!%p1330_p8), 576, %s1386_s11  ;;  %s286_s3 = scalar_lea.sflag (!%p1330_p8), [#allocation3], %s1386_s11 }
  0x2d   : > { %s1390_s17 = scalar_lea.vmem (!%p1330_p8), [#allocation2], %s945_s26 }
  0x2f   : > { %1206 = dma.done.wait (%p1317_p4), %s286_s3, 9216  }
  0x30   : > { %1208 = vsyncadd (%p1317_p4), %s286_s3, 4294958080 }
  0x31   : > { %1210 = dma.done.wait (%p45_p1), [#allocation6], 512  }
  0x32   : > { %1212 = vsyncadd (%p45_p1), [#allocation6], 4294966784  ;;  %v366_v0 = vld [vmem:[%s1390_s17 + $0xf0] sm:$0xff]  ;;  %v367_v2 = vld [vmem:[%s1390_s17 + $0xf8] sm:$0xff]  ;;  %vm426_vm0 = vcmask 261120   ;;  %s1237_s16 = smov 117  }
  0x33   : > { %v406_v1 = vld [vmem:[%s1390_s17 + $0x230] sm:$0xff]  ;;  %433 = vmatpush.msra.mxu0 %v366_v0  ;;  %v364_v3 = vld [vmem:[%s1390_s17 + $0xe0] sm:$0xff]  ;;  %502 = vmatpush.msra.mxu3 %v367_v2  ;;  %v365_v6 = vld [vmem:[%s1390_s17 + $0xe8] sm:$0xff]  ;;  %s1238_s20 = smov 108   ;;  %s1239_s13 = smov 107   ;;  %vm675_vm1 = vcmask 875520  }
  0x34   : > { %491 = vmatpush.msra.mxu2 %v406_v1  ;;  %v398_v4 = vld [vmem:[%s1390_s17 + $0x1f0] sm:$0xff]  ;;  %v404_v5 = vld [vmem:[%s1390_s17 + $0x220] sm:$0xff]  ;;  %v363_v10 = vld [vmem:[%s1390_s17 + $0xd8] sm:$0xff]  ;;  %s1240_s14 = smov 116   ;;  %s1241_s18 = smov 118   ;;  %vm662_vm2 = vcmask 883712  }
  0x35   : > { %456 = vmatpush.msra.mxu1 %v398_v4  ;;  %v362_v7 = vld [vmem:[%s1390_s17 + $0xd0] sm:$0xff]  ;;  %v396_v8 = vld [vmem:[%s1390_s17 + $0x1e0] sm:$0xff]  ;;  %434 = vmatpush.msra.mxu0 %v364_v3  ;;  %v361_v14 = vld [vmem:[%s1390_s17 + $0xc8] sm:$0xff]  ;;  %s1242_s19 = smov 126   ;;  %p331_p1 = scmp.lt.s32.totalorder %s1308_s28, 1  ;;  %vm649_vm3 = vcmask 949248  }
  0x36   : > { %492 = vmatpush.msra.mxu2 %v404_v5  ;;  %v402_v9 = vld [vmem:[%s1390_s17 + $0x210] sm:$0xff]  ;;  %503 = vmatpush.msra.mxu3 %v365_v6  ;;  %v360_v11 = vld [vmem:[%s1390_s17 + $0xc0] sm:$0xff]  ;;  %v399_v15 = vld [vmem:[%s1390_s17 + $0x1f8] sm:$0xff]  ;;  %s1243_s23 = smov 106   ;;  %s1244_s26 = smov 127   ;;  %vm636_vm4 = vcmask 957440  }
  0x37   : > { %457 = vmatpush.msra.mxu1 %v396_v8  ;;  %v394_v12 = vld [vmem:[%s1390_s17 + $0x1d0] sm:$0xff]  ;;  %v400_v13 = vld [vmem:[%s1390_s17 + $0x200] sm:$0xff]  ;;  %435 = vmatpush.msra.mxu0 %v362_v7  ;;  %v359_v18 = vld [vmem:[%s1390_s17 + $0xb8] sm:$0xff]  ;;  %s332_s9 = scalar_select %p331_p1, %s1308_s28, 1  ;;  %vm688_vm5 = vcmask 867328   ;;  %vm623_vm6 = vcmask 965632  }
  0x38   : > { %493 = vmatpush.msra.mxu2 %v402_v9  ;;  %504 = vmatpush.msra.mxu3 %v363_v10  ;;  %v358_v16 = vld [vmem:[%s1390_s17 + $0xb0] sm:$0xff]  ;;  %v392_v17 = vld [vmem:[%s1390_s17 + $0x1c0] sm:$0xff]  ;;  %v397_v19 = vld [vmem:[%s1390_s17 + $0x1e8] sm:$0xff]  ;;  %v1236_v9 = vmov 0   ;;  %vm709_vm7 = vcmask 130048   ;;  %vm610_vm8 = vcmask 1031168  }
  0x39   : > { %458 = vmatpush.msra.mxu1 %v394_v12  ;;  %436 = vmatpush.msra.mxu0 %v360_v11  ;;  %v356_v20 = vld [vmem:[%s1390_s17 + $0xa0] sm:$0xff]  ;;  %v390_v21 = vld [vmem:[%s1390_s17 + $0x1b0] sm:$0xff]  ;;  %v357_v22 = vld [vmem:[%s1390_s17 + $0xa8] sm:$0xff]  ;;  %s941_s29 = sshll.u32 %s332_s9, 4  ;;  %vm597_vm9 = vcmask 1039360   ;;  %s1181_s30 = scalar_lea.hbm %s1583_s7, 32 }
  0x3a   : > { %494 = vmatpush.msra.mxu2 %v400_v13  ;;  %505 = vmatpush.msra.mxu3 %v361_v14  ;;  %v395_v23 = vld [vmem:[%s1390_s17 + $0x1d8] sm:$0xff]  ;;  %v354_v24 = vld [vmem:[%s1390_s17 + $0x90] sm:$0xff]  ;;  %v388_v25 = vld [vmem:[%s1390_s17 + $0x1a0] sm:$0xff] }
  0x3b   : > { %437 = vmatpush.msra.mxu0 %v358_v16  ;;  %459 = vmatpush.msra.mxu1 %v392_v17  ;;  %v355_v26 = vld [vmem:[%s1390_s17 + $0x98] sm:$0xff]  ;;  %v393_v27 = vld [vmem:[%s1390_s17 + $0x1c8] sm:$0xff]  ;;  %v352_v28 = vld [vmem:[%s1390_s17 + $0x80] sm:$0xff] }
  0x3c   : > { %525 = vmatpush.msrb.mxu2 %v399_v15  ;;  %506 = vmatpush.msra.mxu3 %v359_v18  ;;  %v386_v29 = vld [vmem:[%s1390_s17 + $0x190] sm:$0xff]  ;;  %v353_v30 = vld [vmem:[%s1390_s17 + $0x88] sm:$0xff]  ;;  %v391_v31 = vld [vmem:[%s1390_s17 + $0x1b8] sm:$0xff] }
  0x3d   : > { %438 = vmatpush.msra.mxu0 %v356_v20  ;;  %460 = vmatpush.msra.mxu1 %v390_v21  ;;  %v350_v32 = vld [vmem:[%s1390_s17 + $0x70] sm:$0xff]  ;;  %v384_v33 = vld [vmem:[%s1390_s17 + $0x180] sm:$0xff]  ;;  %v351_v34 = vld [vmem:[%s1390_s17 + $0x78] sm:$0xff] }
  0x3e   : > { %526 = vmatpush.msrb.mxu2 %v397_v19  ;;  %507 = vmatpush.msra.mxu3 %v357_v22  ;;  %v389_v35 = vld [vmem:[%s1390_s17 + $0x1a8] sm:$0xff]  ;;  %v348_v36 = vld [vmem:[%s1390_s17 + $0x60] sm:$0xff]  ;;  %v382_v37 = vld [vmem:[%s1390_s17 + $0x170] sm:$0xff] }
  0x3f   : > { %439 = vmatpush.msra.mxu0 %v354_v24  ;;  %461 = vmatpush.msra.mxu1 %v388_v25  ;;  %v349_v38 = vld [vmem:[%s1390_s17 + $0x68] sm:$0xff]  ;;  %v387_v39 = vld [vmem:[%s1390_s17 + $0x198] sm:$0xff]  ;;  %v346_v40 = vld [vmem:[%s1390_s17 + $0x50] sm:$0xff] }
  0x40   : > { %527 = vmatpush.msrb.mxu2 %v395_v23  ;;  %508 = vmatpush.msra.mxu3 %v355_v26  ;;  %v380_v41 = vld [vmem:[%s1390_s17 + $0x160] sm:$0xff]  ;;  %v347_v42 = vld [vmem:[%s1390_s17 + $0x58] sm:$0xff]  ;;  %v385_v43 = vld [vmem:[%s1390_s17 + $0x188] sm:$0xff] }
  0x41   : > { %440 = vmatpush.msra.mxu0 %v352_v28  ;;  %462 = vmatpush.msra.mxu1 %v386_v29  ;;  %v344_v44 = vld [vmem:[%s1390_s17 + $0x40] sm:$0xff]  ;;  %v378_v45 = vld [vmem:[%s1390_s17 + $0x150] sm:$0xff]  ;;  %v345_v47 = vld [vmem:[%s1390_s17 + $0x48] sm:$0xff] }
  0x42   : > { %528 = vmatpush.msrb.mxu2 %v393_v27  ;;  %509 = vmatpush.msra.mxu3 %v353_v30  ;;  %v1449_v46 = vld [vmem:[%s1577_s1 + $0x10] sm:$0xff]  ;;  %v383_v48 = vld [vmem:[%s1390_s17 + $0x178] sm:$0xff]  ;;  %v376_v50 = vld [vmem:[%s1390_s17 + $0x140] sm:$0xff] }
  0x43   : > { %441 = vmatpush.msra.mxu0 %v350_v32  ;;  %463 = vmatpush.msra.mxu1 %v384_v33  ;;  %v342_v49 = vld [vmem:[%s1390_s17 + $0x30] sm:$0xff]  ;;  %v343_v51 = vld [vmem:[%s1390_s17 + $0x38] sm:$0xff]  ;;  %v381_v52 = vld [vmem:[%s1390_s17 + $0x168] sm:$0xff] }
  0x44   : > { %529 = vmatpush.msrb.mxu2 %v391_v31  ;;  %510 = vmatpush.msra.mxu3 %v351_v34  ;;  %v340_v53 = vld [vmem:[%s1390_s17 + $0x20] sm:$0xff]  ;;  %v374_v54 = vld [vmem:[%s1390_s17 + $0x130] sm:$0xff]  ;;  %v341_v55 = vld [vmem:[%s1390_s17 + $0x28] sm:$0xff] }
  0x45   : > { %442 = vmatpush.msra.mxu0 %v348_v36  ;;  %464 = vmatpush.msra.mxu1 %v382_v37  ;;  %v379_v56 = vld [vmem:[%s1390_s17 + $0x158] sm:$0xff]  ;;  %v338_v57 = vld [vmem:[%s1390_s17 + $0x10] sm:$0xff]  ;;  %v372_v58 = vld [vmem:[%s1390_s17 + $0x120] sm:$0xff] }
  0x46   : > { %530 = vmatpush.msrb.mxu2 %v389_v35  ;;  %511 = vmatpush.msra.mxu3 %v349_v38  ;;  %v339_v59 = vld [vmem:[%s1390_s17 + $0x18] sm:$0xff]  ;;  %v377_v60 = vld [vmem:[%s1390_s17 + $0x148] sm:$0xff]  ;;  %v336_v61 = vld [vmem:[%s1390_s17] sm:$0xff] }
  0x47   : > { %443 = vmatpush.msra.mxu0 %v346_v40  ;;  %465 = vmatpush.msra.mxu1 %v380_v41  ;;  %v370_v62 = vld [vmem:[%s1390_s17 + $0x110] sm:$0xff]  ;;  %v413_v63 = vld [vmem:[%s1577_s1 + $0x28] sm:$0xff]  ;;  %v408_v1 = vld [vmem:[%s1577_s1] sm:$0xff] }
  0x48   : > { %531 = vmatpush.msrb.mxu2 %v387_v39  ;;  %512 = vmatpush.msra.mxu3 %v347_v42  ;;  %v337_v0 = vld [vmem:[%s1390_s17 + $0x8] sm:$0xff]  ;;  %v375_v2 = vld [vmem:[%s1390_s17 + $0x138] sm:$0xff]  ;;  %v368_v4 = vld [vmem:[%s1390_s17 + $0x100] sm:$0xff] }
  0x49   : > { %444 = vmatpush.msra.mxu0 %v344_v44  ;;  %466 = vmatpush.msra.mxu1 %v378_v45  ;;  %v407_v3 = vld [vmem:[%s1390_s17 + $0x238] sm:$0xff]  ;;  %v409_v5 = vld [vmem:[%s1577_s1 + $0x8] sm:$0xff]  ;;  %v412_v15 = vld [vmem:[%s1577_s1 + $0x20] sm:$0xff] }
  0x4a   : > { %532 = vmatpush.msrb.mxu2 %v385_v43  ;;  %513 = vmatpush.msra.mxu3 %v345_v47  ;;  %v373_v6 = vld [vmem:[%s1390_s17 + $0x128] sm:$0xff]  ;;  %v371_v10 = vld [vmem:[%s1390_s17 + $0x118] sm:$0xff]  ;;  %v414_v16 = vld [vmem:[%s1578_s2] sm:$0xff] }
  0x4b   : > { %930 = vmatmul.msk.f32.vlgmr.msra.gmra.mxu2 %vm426_vm0, %v1449_v46  ;;  %445 = vmatpush.msra.mxu0 %v342_v49  ;;  %v415_v7 = vld [vmem:[%s1578_s2 + $0x8] sm:$0xff]  ;;  %v403_v11 = vld [vmem:[%s1390_s17 + $0x218] sm:$0xff]  ;;  %v575_v28 = vld [vmem:[%s1581_s5] sm:$0x3] }
  0x4c   : > { %533 = vmatpush.msrb.mxu2 %v383_v48  ;;  %467 = vmatpush.msra.mxu1 %v376_v50  ;;  %v405_v8 = vld [vmem:[%s1390_s17 + $0x228] sm:$0xff]  ;;  %v411_v13 = vld [vmem:[%s1577_s1 + $0x18] sm:$0xff]  ;;  %v577_v35 = vperm.slane %v575_v28, 0  ;;  %v578_v39 = vperm.slane %v575_v28, 1 }
  0x4d   : > { %514 = vmatpush.msra.mxu3 %v343_v51  ;;  %446 = vmatpush.msra.mxu0 %v340_v53  ;;  %v369_v12 = vld [vmem:[%s1390_s17 + $0x108] sm:$0xff] }
  0x4e   : > { %534 = vmatpush.msrb.mxu2 %v381_v52  ;;  %468 = vmatpush.msra.mxu1 %v374_v54  ;;  %v401_v14 = vld [vmem:[%s1390_s17 + $0x208] sm:$0xff]  ;;  %s1521_s17 = scalar_lea.vmem %s1582_s6, %s941_s29 }
  0x4f   : > { %515 = vmatpush.msra.mxu3 %v341_v55  ;;  %447 = vmatpush.msra.mxu0 %v338_v57  ;;  %v765_v57 = vld [vmem:[%s1521_s17 + $0x8] sm:$0xff] }
  0x50   : > { %535 = vmatpush.msrb.mxu2 %v379_v56  ;;  %469 = vmatpush.msra.mxu1 %v372_v58  ;;  %v697_v56 = vld [vmem:[%s1580_s4] sm:$0xff] }
  0x51   : > { %516 = vmatpush.msra.mxu3 %v339_v59  ;;  %448 = vmatpush.msra.mxu0 %v336_v61 }
  0x52   : > { %536 = vmatpush.msrb.mxu2 %v377_v60  ;;  %470 = vmatpush.msra.mxu1 %v370_v62 }
  0x53   : > { %931 = vmatmul.msk.f32.gmra.mxu2 %vm426_vm0, %v413_v63  ;;  %517 = vmatpush.msra.mxu3 %v337_v0 }
  0x54   : > { %449 = vmatmul.f32.vlgmr.msra.gmra.mxu0 %v408_v1  ;;  %518 = vmatmul.f32.vlgmr.msra.gmra.mxu3 %v408_v1 }
  0x55   : > { %537 = vmatpush.msrb.mxu2 %v375_v2  ;;  %560 = vmatpush.msrb.mxu0 %v407_v3 }
  0x56   : > { %471 = vmatpush.msra.mxu1 %v368_v4  ;;  %1016 = vset.pattern.permute.xlu0 %v1236_v9 }
  0x57   : > { %472 = vmatmul.f32.vlgmr.msra.gmra.mxu1 %v409_v5  ;;  %538 = vmatpush.msrb.mxu2 %v373_v6 }
  0x58   : > { %423 = vperm.xlu0 %1016, %v415_v7   ;;  %561 = vmatpush.msrb.mxu0 %v405_v8 }
  0x59   : > { %1097 = vset.pattern.permute.xlu1 %v1236_v9  ;;  %539 = vmatpush.msrb.mxu2 %v371_v10 }
  0x5a   : > { %1098 = vset.pattern.permute.xlu2 %v1236_v9  ;;  %562 = vmatpush.msrb.mxu0 %v403_v11 }
  0x5b   : > { %540 = vmatpush.msrb.mxu2 %v369_v12 }
  0x5c   : > { %452 = vmatmul.f32.gmra.mxu0 %v411_v13  ;;  %541 = vmatmul.f32.vlgmr.msrb.gmra.mxu2 %v409_v5 }
  0x5d   : > { %521 = vmatmul.f32.gmra.mxu3 %v411_v13  ;;  %563 = vmatpush.msrb.mxu0 %v401_v14 }
  0x5f   : > { %475 = vmatmul.f32.gmra.mxu1 %v412_v15 }
  0x60   : > { %418 = vperm.xlu0 %1016, %v414_v16  }
  0x64   : > { %932 = vmatmul.msk.f32.vlgmr.msrb.gmra.mxu0 %vm426_vm0, %v1449_v46  ;;  %544 = vmatmul.f32.gmra.mxu2 %v412_v15 }
  0x6c   : > { %933 = vmatmul.msk.f32.gmra.mxu0 %vm426_vm0, %v413_v63 }
  0xca   : > { %v424_v17 = vpop.permute.xlu0 %423 }
  0xce   : > { %v496_v18 = vpop.f32.mrf.mxu2 }
  0xd1   : > { %v450_v19 = vpop.f32.mrf.mxu0 }
  0xd2   : > { %v419_v20 = vpop.permute.xlu0 %418 }
  0xd3   : > { %v451_v23 = vadd.f32 %v450_v19, %v419_v20 }
  0xd4   : > { %v473_v21 = vpop.f32.mrf.mxu1 }
  0xd5   : > { %v474_v26 = vadd.f32 %v473_v21, %v451_v23 }
  0xd6   : > { %v499_v22 = vpop.f32.mrf.mxu2 }
  0xd7   : > { %v519_v25 = vpop.f32.mrf.mxu3  ;;  %v497_v27 = vadd.f32 %v496_v18, %v474_v26 }
  0xd8   : > { %v520_v29 = vadd.f32 %v519_v25, %v419_v20 }
  0xd9   : > { %v453_v24 = vpop.f32.mrf.mxu0  ;;  %v571_v36 = vmax.f32 %v497_v27, 0.0 }
  0xda   : > { %v454_v30 = vadd.f32 %v453_v24, %v424_v17 }
  0xdb   : > { %v1507_v42 = vmul.f32 %v577_v35, %v571_v36 }
  0xdc   : > { %v476_v31 = vpop.f32.mrf.mxu1 }
  0xdd   : > { %v477_v37 = vadd.f32 %v476_v31, %v454_v30 }
  0xdf   : > { %v542_v32 = vpop.f32.mrf.mxu2  ;;  %v500_v43 = vadd.f32 %v499_v22, %v477_v37 }
  0xe0   : > { %v543_v33 = vadd.f32 %v542_v32, %v520_v29  ;;  %v522_v40 = vpop.f32.mrf.mxu3 }
  0xe1   : > { %v565_v34 = vpop.f32.mrf.mxu0  ;;  %v523_v44 = vadd.f32 %v522_v40, %v424_v17  ;;  %v573_v50 = vmax.f32 %v500_v43, 0.0  ;;  %v698_v40 = vld [vmem:[%s1580_s4 + $0x8] sm:$0xff] }
  0xe2   : > { %v566_v38 = vadd.f32 %v565_v34, %v543_v33 }
  0xe3   : > { %v1510_v53 = vmul.f32 %v577_v35, %v573_v50 }
  0xe4   : > { %v572_v41 = vmax.f32 %v566_v38, 0.0 }
  0xe6   : > { %v582_v45 = vmul.f32 %v578_v39, %v572_v41  ;;  %v764_v41 = vld [vmem:[%s1521_s17] sm:$0xff] }
  0xe7   : > { %v545_v46 = vpop.f32.mrf.mxu2 }
  0xe8   : > { %v546_v47 = vadd.f32 %v545_v46, %v523_v44  ;;  %v1037_v49 = vpack.i.bf16 %v582_v45, %v1507_v42 }
  0xe9   : > { %v568_v48 = vpop.f32.mrf.mxu0 }
  0xea   : > { %v569_v51 = vadd.f32 %v568_v48, %v546_v47  ;;  %1038 = vrot.lane.b32.xlu0 %v1037_v49, %s1237_s16  ;;  %1023 = vrot.lane.b32.xlu2 %v1037_v49, %s1238_s20  ;;  %v694_v47 = vld [vmem:[#allocation5 + $0x8] sm:$0xff] }
  0xeb   : > { %1018 = vrot.lane.b32.xlu1 %v1037_v49, %s1239_s13 }
  0xec   : > { %v574_v52 = vmax.f32 %v569_v51, 0.0 }
  0xee   : > { %v584_v54 = vmul.f32 %v578_v39, %v574_v52 }
  0xf0   : > { %v1052_v55 = vpack.i.bf16 %v584_v54, %v1510_v53 }
  0xf2   : > { %1053 = vrot.lane.b32.xlu0 %v1052_v55, %s1240_s14  ;;  %1043 = vrot.lane.b32.xlu2 %v1037_v49, %s1241_s18 }
  0xf3   : > { %1028 = vrot.lane.b32.xlu1 %v1052_v55, %s1239_s13  ;;  %s942_s13 = sshll.u32 %s1308_s28, 4  ;;  %s810_s28 = scalar_lea.sflag [#allocation4], %s1386_s11 }
  0xfa   : > { %1073 = vrot.lane.b32.xlu0 %v1052_v55, %s1242_s19  ;;  %1048 = vrot.lane.b32.xlu2 %v1052_v55, %s1238_s20  ;;  %s927_s20 = sshll.u32 %s1386_s11, 4 }
  0xfb   : > { %1033 = vrot.lane.b32.xlu1 %v1037_v49, %s1240_s14 }
 0x102   : > { %1083 = vrot.lane.b32.xlu0 %v1052_v55, %s1243_s23  ;;  %1058 = vrot.lane.b32.xlu2 %v1052_v55, %s1237_s16 }
 0x103   : > { %1063 = vrot.lane.b32.xlu1 %v1052_v55, %s1241_s18 }
 0x10a   : > { %701 = vperm.xlu0 %1016, %v697_v56   ;;  %1078 = vrot.lane.b32.xlu2 %v1052_v55, %s1244_s26 }
 0x10b   : > { %1068 = vrot.lane.b32.xlu1 %v1037_v49, %s1242_s19  ;;  %s821_s19 = scalar_lea.hbm %s1583_s7, %s942_s13 }
 0x10c   : > { %s824_s10 = sshll.u32 %s821_s19, 4  ;;  %s825_s10 = int_to_ptr.hbm [resolvable:$true] %s824_s10 }
 0x10d   : > { %s1175_s22 = sshra.s32 %s825_s10, 4  ;;  %s1176_s22 = int_to_ptr.hbm [resolvable:$true] %s1175_s22 }
 0x10e   : > { %s1177_s29 = scalar_lea.hbm %s1176_s22, 16  ;;  %p1182_p9 = scmp.lt.s32.totalorder %s1176_s22, %s1583_s7 }
 0x10f   : > { %p1178_p4 = scmp.ne.s32.totalorder %s1176_s22, %s1177_s29  ;;  %p1183_p2 = scmp.lt.s32.totalorder %s1181_s30, %s1177_s29 }
 0x111   : > { %p1179_p8 = pnand %p1178_p4, %p1357_p7  ;;  %p1184_p10 = por %p1183_p2, %p1182_p9 }
 0x112   : > { %782 = vperm.xlu0 %1016, %v765_v57   ;;  %1093 = vrot.lane.b32.xlu2 %v1037_v49, %s1243_s23  ;;  %s330_s23 = scalar_lea.vmem [#allocation7], %s927_s20 }
 0x113   : > { %1088 = vrot.lane.b32.xlu1 %v1037_v49, %s1244_s26  ;;  %s822_s9 = sshll.u32 %s330_s23, 4  ;;  %p1180_p11 = pneg %p1179_p8  ;;  %s823_s9 = int_to_ptr.vmem [resolvable:$true] %s822_s9 }
 0x115   : > { %p1185_p12 = pnand %p1184_p10, %p1180_p11 }
 0x11a   : > { %777 = vperm.xlu2 %1098, %v764_v41  }
 0x11b   : > { %706 = vperm.xlu1 %1097, %v698_v40  }
 0x144   : > { %v1024_v58 = vpop.permute.xlu2 %1023 }
 0x145   : > { %v1026_v10 = vunpack.i.h.bf16 %v1024_v58  ;;  %v1025_v11 = vunpack.i.l.bf16 %v1024_v58  ;;  %v696_v58 = vld [vmem:[#allocation5 + $0x18] sm:$0xff] }
 0x147   : > { %v663_v20 = vsel %vm662_vm2, %v1025_v11, %v1026_v10 }
 0x14c   : > { %v1524_v59 = vpop.permute.xlu2 %1043 }
 0x14d   : > { %v1046_v28 = vunpack.i.h.bf16 %v1524_v59  ;;  %v1045_v29 = vunpack.i.l.bf16 %v1524_v59 }
 0x14f   : > { %v624_v49 = vsel %vm623_vm6, %v1045_v29, %v1046_v28 }
 0x154   : > { %v1049_v60 = vpop.permute.xlu2 %1048 }
 0x155   : > { %v1051_v6 = vunpack.i.h.bf16 %v1049_v60  ;;  %v1050_v7 = vunpack.i.l.bf16 %v1049_v60 }
 0x157   : > { %v664_v16 = vsel %vm662_vm2, %v1050_v7, %v1051_v6 }
 0x15c   : > { %v1039_v61 = vpop.permute.xlu0 %1038  ;;  %v1059_v63 = vpop.permute.xlu2 %1058 }
 0x15d   : > { %v1019_v62 = vpop.permute.xlu1 %1018  ;;  %v1061_v21 = vunpack.i.h.bf16 %v1059_v63  ;;  %v1060_v22 = vunpack.i.l.bf16 %v1059_v63  ;;  %v1041_v24 = vunpack.i.h.bf16 %v1039_v61  ;;  %v1040_v25 = vunpack.i.l.bf16 %v1039_v61 }
 0x15e   : > { %v1021_v2 = vunpack.i.h.bf16 %v1019_v62  ;;  %v1020_v3 = vunpack.i.l.bf16 %v1019_v62 }
 0x15f   : > { %v638_v31 = vsel %vm636_vm4, %v1060_v22, %v1061_v21  ;;  %v637_v39 = vsel %vm636_vm4, %v1040_v25, %v1041_v24 }
 0x160   : > { %v676_v12 = vsel %vm675_vm1, %v1020_v3, %v1021_v2 }
 0x164   : > { %v1054_v0 = vpop.permute.xlu0 %1053  ;;  %v1526_v8 = vpop.permute.xlu2 %1078 }
 0x165   : > { %v1029_v1 = vpop.permute.xlu1 %1028  ;;  %v1056_v13 = vunpack.i.h.bf16 %v1054_v0  ;;  %v1055_v14 = vunpack.i.l.bf16 %v1054_v0  ;;  %v1081_v52 = vunpack.i.h.bf16 %v1526_v8  ;;  %v1080_v54 = vunpack.i.l.bf16 %v1526_v8  ;;  %v693_v0 = vld [vmem:[#allocation5] sm:$0xff] }
 0x166   : > { %v1031_v4 = vunpack.i.h.bf16 %v1029_v1  ;;  %v1030_v5 = vunpack.i.l.bf16 %v1029_v1  ;;  %v695_v1 = vld [vmem:[#allocation5 + $0x10] sm:$0xff] }
 0x167   : > { %v651_v23 = vsel %vm649_vm3, %v1055_v14, %v1056_v13  ;;  %v599_v59 = vsel %vm597_vm9, %v1080_v54, %v1081_v52 }
 0x168   : > { %v677_v9 = vsel %vm675_vm1, %v1030_v5, %v1031_v4 }
 0x169   : > { %716 = vmatpush.msrb.mxu1 %v677_v9 }
 0x16b   : > { %717 = vmatpush.msrb.mxu1 %v676_v12 }
 0x16c   : > { %v1074_v15 = vpop.permute.xlu0 %1073  ;;  %v1094_v26 = vpop.permute.xlu2 %1093 }
 0x16d   : > { %v1034_v17 = vpop.permute.xlu1 %1033  ;;  %718 = vmatpush.msrb.mxu1 %v664_v16  ;;  %v1096_v32 = vunpack.i.h.bf16 %v1094_v26  ;;  %v1095_v33 = vunpack.i.l.bf16 %v1094_v26  ;;  %v1076_v44 = vunpack.i.h.bf16 %v1074_v15  ;;  %v1075_v45 = vunpack.i.l.bf16 %v1074_v15 }
 0x16e   : > { %v1036_v18 = vunpack.i.h.bf16 %v1034_v17  ;;  %v1035_v19 = vunpack.i.l.bf16 %v1034_v17 }
 0x16f   : > { %719 = vmatpush.msrb.mxu1 %v663_v20  ;;  %v689_v48 = vsel %vm688_vm5, %v1095_v33, %v1096_v32  ;;  %v612_v50 = vsel %vm610_vm8, %v1075_v45, %v1076_v44 }
 0x170   : > { %v650_v27 = vsel %vm649_vm3, %v1035_v19, %v1036_v18 }
 0x171   : > { %720 = vmatpush.msrb.mxu1 %v651_v23 }
 0x173   : > { %721 = vmatpush.msrb.mxu1 %v650_v27 }
 0x174   : > { %v1084_v30 = vpop.permute.xlu0 %1083 }
 0x175   : > { %v1086_v34 = vunpack.i.h.bf16 %v1084_v30  ;;  %v1085_v35 = vunpack.i.l.bf16 %v1084_v30  ;;  %v1064_v36 = vpop.permute.xlu1 %1063  ;;  %722 = vmatpush.msrb.mxu1 %v638_v31 }
 0x176   : > { %v1066_v37 = vunpack.i.h.bf16 %v1064_v36  ;;  %v1065_v38 = vunpack.i.l.bf16 %v1064_v36 }
 0x177   : > { %723 = vmatpush.msrb.mxu1 %v637_v39  ;;  %v690_v43 = vsel %vm688_vm5, %v1085_v35, %v1086_v34 }
 0x178   : > { %v625_v46 = vsel %vm623_vm6, %v1065_v38, %v1066_v37  ;;  %753 = vmatpush.msrb.mxu3 %v690_v43 }
 0x179   : > { %724 = vmatpush.msrb.mxu1 %v625_v46 }
 0x17a   : > { %754 = vmatpush.msrb.mxu3 %v689_v48 }
 0x17b   : > { %725 = vmatpush.msrb.mxu1 %v624_v49  ;;  %934 = vmatmul.msk.f32.vlgmr.msrb.gmra.mxu3 %vm709_vm7, %v694_v47 }
 0x17c   : > { %v702_v4 = vpop.permute.xlu0 %701 }
 0x17d   : > { %v1069_v51 = vpop.permute.xlu1 %1068  ;;  %726 = vmatpush.msrb.mxu1 %v612_v50 }
 0x17e   : > { %v1071_v55 = vunpack.i.h.bf16 %v1069_v51  ;;  %v1070_v56 = vunpack.i.l.bf16 %v1069_v51 }
 0x180   : > { %v611_v57 = vsel %vm610_vm8, %v1070_v56, %v1071_v55 }
 0x181   : > { %727 = vmatpush.msrb.mxu1 %v611_v57 }
 0x183   : > { %728 = vmatpush.msrb.mxu1 %v599_v59  ;;  %935 = vmatmul.msk.f32.gmra.mxu3 %vm709_vm7, %v696_v58 }
 0x184   : > { %v783_v16 = vpop.permute.xlu0 %782 }
 0x185   : > { %v1089_v60 = vpop.permute.xlu1 %1088 }
 0x186   : > { %v1091_v61 = vunpack.i.h.bf16 %v1089_v60  ;;  %v1090_v62 = vunpack.i.l.bf16 %v1089_v60 }
 0x188   : > { %v598_v63 = vsel %vm597_vm9, %v1090_v62, %v1091_v61 }
 0x189   : > { %729 = vmatpush.msrb.mxu1 %v598_v63 }
 0x18b   : > { %730 = vmatpush.msrb.mxu1 %v1510_v53 }
 0x18d   : > { %731 = vmatpush.msrb.mxu1 %v1507_v42  ;;  %v707_v6 = vpop.permute.xlu1 %706  ;;  %v778_v42 = vpop.permute.xlu2 %777 }
 0x18e   : > { %732 = vmatmul.f32.vlgmr.msrb.gmra.mxu1 %v693_v0 }
 0x196   : > { %735 = vmatmul.f32.gmra.mxu1 %v695_v1 }
 0x1fe   : > { %v756_v2 = vpop.f32.mrf.mxu3 }
 0x206   : > { %v759_v9 = vpop.f32.mrf.mxu3 }
 0x20b   : > { %v733_v3 = vpop.f32.mrf.mxu1 }
 0x20c   : > { %v734_v5 = vadd.f32 %v733_v3, %v702_v4 }
 0x20e   : > { %v757_v7 = vadd.f32 %v756_v2, %v734_v5 }
 0x210   : > { %v762_v11 = vmax.f32 %v757_v7, 0.0 }
 0x212   : > { %v766_v14 = vmul.f32 %v762_v11, %v762_v11  ;;  %v785_v19 = vmul.f32 %v778_v42, %v762_v11 }
 0x213   : > { %v736_v8 = vpop.f32.mrf.mxu1 }
 0x214   : > { %v737_v10 = vadd.f32 %v736_v8, %v707_v6 }
 0x216   : > { %v760_v12 = vadd.f32 %v759_v9, %v737_v10 }
 0x218   : > { %v763_v13 = vmax.f32 %v760_v12, 0.0 }
 0x21a   : > { %v767_v53 = vmul.f32 %v763_v13, %v763_v13  ;;  %v786_v18 = vmul.f32 %v783_v16, %v763_v13 }
 0x21c   : > { %v768_v15 = vadd.f32 %v767_v53, %v766_v14  ;;  %v787_v22 = vadd.f32 %v786_v18, %v785_v19 }
 0x21e   : > { %v769_v17 = vrot.slane %v768_v15, 4  ;;  %v788_v25 = vrot.slane %v787_v22, 4 }
 0x220   : > { %v770_v20 = vadd.f32 %v769_v17, %v768_v15  ;;  %v789_v27 = vadd.f32 %v788_v25, %v787_v22 }
 0x222   : > { %v771_v21 = vrot.slane %v770_v20, 2  ;;  %v790_v28 = vrot.slane %v789_v27, 2 }
 0x224   : > { %v772_v23 = vadd.f32 %v771_v21, %v770_v20  ;;  %v791_v31 = vadd.f32 %v790_v28, %v789_v27 }
 0x226   : > { %v773_v24 = vrot.slane %v772_v23, 1  ;;  %v792_v34 = vrot.slane %v791_v31, 1 }
 0x228   : > { %v774_v26 = vadd.f32 %v773_v24, %v772_v23  ;;  %v793_v37 = vadd.f32 %v792_v34, %v791_v31 }
 0x22a   : > { %1099 = vrsqrt.f32 %v774_v26  ;;  %vm800_vm11 = vweird.f32 %v774_v26 }
 0x230   : > { %v1100_v29 = vpop.eup %1099 }
 0x231   : > { %v795_v30 = vmul.f32 %v1100_v29, %v774_v26  ;;  %vm801_vm10 = vweird.f32 %v1100_v29 }
 0x232   : > { %vm802_vm12 = vmor %vm800_vm11, %vm801_vm10 }
 0x233   : > { %v796_v32 = vmul.f32 %v1100_v29, %v795_v30 }
 0x235   : > { %v797_v33 = vmul.f32 0.5, %v796_v32 }
 0x237   : > { %v798_v35 = vsub.f32 1.5, %v797_v33 }
 0x239   : > { %v799_v36 = vmul.f32 %v1100_v29, %v798_v35 }
 0x23b   : > { %v803_v38 = vsel %vm802_vm12, %v1100_v29, %v799_v36 }
 0x23c   : > { %v804_v39 = vmul.f32 %v803_v38, %v793_v37 }
 0x23e   : > { %v805_v40 = vmul.f32 %v804_v39, %v762_v11  ;;  %v806_v41 = vmul.f32 %v804_v39, %v763_v13 }
 0x240   : > { %807 = vst [vmem:[%s330_s23] sm:$0xff] %v805_v40 }
 0x241   : > { %808 = vst [vmem:[%s330_s23 + $0x8] sm:$0xff] %v806_v41 }
 0x242   : > { %1188 = shalt.err (!%p1185_p12)
}
 0x243   : > { %s1245_s11 = smov 128   ;;  %s1246_s16 = smov 8  }
 0x244   : > { %952 = dma.vmem_to_hbm [thread:$0]  (%p1357_p7), %s823_s9, 256, %s825_s10, %s810_s28, %s1245_s11, %s1245_s11, %s1246_s16  }
 0x245 PF: > { %s839_s20 = sand.u32 1, %s1219_s24   ;;  %p1598_p13 = scmp.ge.s32.totalorder %s1231_s27, 2 }
 0x246   : > { %s840_s13 = scalar_lea.sflag [#allocation4], %s839_s20 }
 0x247   : > { %p963_p0 = pnand %p1598_p13, %p1322_p6 }
 0x249   : > { %p964_p3 = pneg %p963_p0 }
 0x24b   : > { %1214 = dma.done.wait (%p964_p3), %s840_s13, 256  }
 0x24c   : > { %1216 = vsyncadd (%p964_p3), %s840_s13, 4294967040  ;;  %s1599_s14 = sld [smem:[#allocation11_spill]]  ;;  %p21_p5 = scmp.ge.s32.totalorder %s1340_s15, 4  }
 0x24d   : > { %s1600_s26 = sld [smem:[#allocation12_spill]]  ;;  %s1601_s24 = smov %s1223_s25 }
 0x24e   : > { %s1603_s27 = smov %s1340_s15  ;;  %23 = sbr.rel (!%p21_p5) target bundleno = 8 (0x8), region = 100 }
 0x252   : > { %s1602_s25 = smov %s1599_s14 }
 0x253   :  { %846 = vsyncpa [#allocation3], 1 }
 0x254   :  { %848 = vsyncpa [#allocation3 + $0x1], 1 }
 0x255   :  { %849 = vsyncpa [#allocation6], 1 }
 0x256   :  { %850 = vsyncpa [#allocation4], 1 }
 0x257   :  { %852 = vsyncpa [#allocation4 + $0x1], 1 }

</bundles_post_ra>
